<compile_context>
chip_gen: v7x
topology: tpu7x:2x2x1
jax: 0.10.0
libtpu: 0.0.40
codegen_flags: <defaults>
</compile_context>

<pallas_src>
import functools

import jax
import jax.numpy as jnp
from jax.experimental import pallas as pl
from jax.experimental.pallas import tpu as pltpu

LANE = 128      # vreg lane width
SUBLANE = 8     # f32 sublane count


def _round_up(x, m):
    return (x + m - 1) // m * m


def actor_kernel(s_ref, w1_ref, b1_ref, w2_ref, b2_ref, u_ref):
    # fc + ReLU  (MXU matmul, f32 accumulate; VPU max for ReLU)
    h = jnp.dot(s_ref[...], w1_ref[...], preferred_element_type=jnp.float32)
    h = jnp.maximum(h + b1_ref[...], 0.0)
    # mu_head + 2*tanh  (MXU matmul; tanh on the EUP)
    u = jnp.dot(h, w2_ref[...], preferred_element_type=jnp.float32)
    u_ref[...] = 2.0 * jnp.tanh(u + b2_ref[...])


def pad_params(w1, b1, w2, b2):
    """Zero-pad hidden and action dims up to the 128-lane width (done once)."""
    n_states, hidden = w1.shape
    n_actions = w2.shape[1]
    h_pad = _round_up(hidden, LANE)
    n_pad = _round_up(n_actions, LANE)
    w1p = jnp.zeros((n_states, h_pad), jnp.float32).at[:, :hidden].set(w1)
    b1p = jnp.zeros((1, h_pad), jnp.float32).at[:, :hidden].set(
        jnp.asarray(b1, jnp.float32).reshape(1, -1))
    w2p = jnp.zeros((h_pad, n_pad), jnp.float32).at[:hidden, :n_actions].set(w2)
    b2p = jnp.zeros((1, n_pad), jnp.float32).at[:, :n_actions].set(
        jnp.asarray(b2, jnp.float32).reshape(1, -1))
    return w1p, b1p, w2p, b2p


@functools.partial(jax.jit, static_argnames=("n_actions", "tile_b"))
def actor_net_forward(s, w1p, b1p, w2p, b2p, *, n_actions, tile_b=256):
    """s: (B, n_states) f32 -> u: (B, n_actions) f32.

    Takes pre-padded params from pad_params().  Batch is tiled on a 1-D grid;
    weights/biases use constant index_maps so they stay VMEM-resident.
    """
    B, n_states = s.shape
    h_pad = w1p.shape[1]
    n_pad = w2p.shape[1]

    # Effective batch tile: multiple of the f32 sublane (8), no larger than B.
    tb = min(tile_b, _round_up(B, SUBLANE))
    tb = max(SUBLANE, _round_up(tb, SUBLANE))
    b_pad = _round_up(B, tb)
    if b_pad != B:
        s = jnp.pad(s, ((0, b_pad - B), (0, 0)))

    grid = (b_pad // tb,)

    u_padded = pl.pallas_call(
        actor_kernel,
        out_shape=jax.ShapeDtypeStruct((b_pad, n_pad), jnp.float32),
        grid=grid,
        in_specs=[
            # batch-tiled activation stream
            pl.BlockSpec((tb, n_states), lambda i: (i, 0)),
            # weights/biases: constant block index -> DMA'd once, VMEM-resident
            pl.BlockSpec((n_states, h_pad), lambda i: (0, 0)),
            pl.BlockSpec((1, h_pad), lambda i: (0, 0)),
            pl.BlockSpec((h_pad, n_pad), lambda i: (0, 0)),
            pl.BlockSpec((1, n_pad), lambda i: (0, 0)),
        ],
        out_specs=pl.BlockSpec((tb, n_pad), lambda i: (i, 0)),
        compiler_params=pltpu.CompilerParams(
            dimension_semantics=("parallel",),      # shards batch across TCs on v7x
            vmem_limit_bytes=32 * 1024 * 1024,      # generous headroom; safe on 64 MiB v7x
        ),
    )(s, w1p, b1p, w2p, b2p)

    return u_padded[:B, :n_actions]


def init_params(key, n_states, n_actions, hidden=100):
    """Deterministic synthetic init (PyTorch-style uniform(-1/sqrt(fan_in), ...))."""
    k1, k2, k3, k4 = jax.random.split(key, 4)
    lim1 = 1.0 / jnp.sqrt(jnp.float32(n_states))
    lim2 = 1.0 / jnp.sqrt(jnp.float32(hidden))
    # Stored as (in, out): equivalent to PyTorch weight.T
    w1 = jax.random.uniform(k1, (n_states, hidden), jnp.float32, -lim1, lim1)
    b1 = jax.random.uniform(k2, (1, hidden), jnp.float32, -lim1, lim1)
    w2 = jax.random.uniform(k3, (hidden, n_actions), jnp.float32, -lim2, lim2)
    b2 = jax.random.uniform(k4, (1, n_actions), jnp.float32, -lim2, lim2)
    return w1, b1, w2, b2


def actor_net_reference(s, w1, b1, w2, b2):
    x = jnp.maximum(s @ w1 + b1, 0.0)
    return 2.0 * jnp.tanh(x @ w2 + b2)


if __name__ == "__main__":
    key = jax.random.PRNGKey(0)
    k_s, k_p = jax.random.split(key)

    # Batch large enough to exercise the batch grid (2 tiles of 128 rows).
    B, n_states, n_actions, hidden = 256, 32, 4, 100
    s = jax.random.normal(k_s, (B, n_states), jnp.float32)
    w1, b1, w2, b2 = init_params(k_p, n_states, n_actions, hidden)
    w1p, b1p, w2p, b2p = pad_params(w1, b1, w2, b2)

    u = actor_net_forward(s, w1p, b1p, w2p, b2p, n_actions=n_actions, tile_b=128)
    u = jax.block_until_ready(u)

    u_ref = actor_net_reference(s, w1, b1, w2, b2)
    assert u.shape == (B, n_actions)
    assert jnp.allclose(u, u_ref, atol=1e-5, rtol=1e-5)

    # Also check a ragged batch (padding path) for robustness.
    s_small = s[:13]
    u_small = jax.block_until_ready(
        actor_net_forward(s_small, w1p, b1p, w2p, b2p,
                          n_actions=n_actions, tile_b=128))
    assert u_small.shape == (13, n_actions)
    assert jnp.allclose(u_small, u_ref[:13], atol=1e-5, rtol=1e-5)

    print("KERNEL_OK")
</pallas_src>

<mosaic_0001>
module attributes {stable_mosaic.version = 11 : i64} {
  func.func @actor_kernel(%arg0: i32, %arg1: memref<128x32xf32, #tpu.memory_space<vmem>>, %arg2: memref<32x128xf32, #tpu.memory_space<vmem>>, %arg3: memref<1x128xf32, #tpu.memory_space<vmem>>, %arg4: memref<128x128xf32, #tpu.memory_space<vmem>>, %arg5: memref<1x128xf32, #tpu.memory_space<vmem>>, %arg6: memref<128x128xf32, #tpu.memory_space<vmem>>) attributes {dimension_semantics = [#tpu.dimension_semantics<parallel>], iteration_bounds = array<i64: 2>, scalar_prefetch = 0 : i64, scratch_operands = 0 : i64, tpu.core_type = #tpu.core_type<tc>, window_params = [{transform_indices = @transform_0, window_bounds = array<i64: 128, 32>}, {pipeline_mode = #tpu.pipeline_mode<synchronous>, transform_indices = @transform_1, window_bounds = array<i64: 32, 128>}, {pipeline_mode = #tpu.pipeline_mode<synchronous>, transform_indices = @transform_2, window_bounds = array<i64: 1, 128>}, {pipeline_mode = #tpu.pipeline_mode<synchronous>, transform_indices = @transform_3, window_bounds = array<i64: 128, 128>}, {pipeline_mode = #tpu.pipeline_mode<synchronous>, transform_indices = @transform_4, window_bounds = array<i64: 1, 128>}, {transform_indices = @transform_5, window_bounds = array<i64: 128, 128>}]} {
    %c0 = arith.constant 0 : index
    %c0_0 = arith.constant 0 : index
    %0 = vector.load %arg1[%c0, %c0_0] : memref<128x32xf32, #tpu.memory_space<vmem>>, vector<128x32xf32>
    %c0_1 = arith.constant 0 : index
    %c0_2 = arith.constant 0 : index
    %1 = vector.load %arg2[%c0_1, %c0_2] : memref<32x128xf32, #tpu.memory_space<vmem>>, vector<32x128xf32>
    %cst = arith.constant dense<0.000000e+00> : vector<128x128xf32>
    %2 = tpu.matmul %0, %1, %cst {dimension_numbers = #tpu.dot_dimension_numbers<[1], [0], [0], [1], [0, 0, 1, 1], [], []>} : vector<128x32xf32>, vector<32x128xf32>, vector<128x128xf32> -> vector<128x128xf32>
    %c0_3 = arith.constant 0 : index
    %c0_4 = arith.constant 0 : index
    %3 = vector.load %arg3[%c0_3, %c0_4] : memref<1x128xf32, #tpu.memory_space<vmem>>, vector<1x128xf32>
    %4 = vector.broadcast %3 : vector<1x128xf32> to vector<128x128xf32>
    %5 = arith.addf %2, %4 : vector<128x128xf32>
    %cst_5 = arith.constant 0.000000e+00 : f32
    %6 = vector.broadcast %cst_5 : f32 to vector<128x128xf32>
    %7 = arith.maximumf %5, %6 : vector<128x128xf32>
    %c0_6 = arith.constant 0 : index
    %c0_7 = arith.constant 0 : index
    %8 = vector.load %arg4[%c0_6, %c0_7] : memref<128x128xf32, #tpu.memory_space<vmem>>, vector<128x128xf32>
    %cst_8 = arith.constant dense<0.000000e+00> : vector<128x128xf32>
    %9 = tpu.matmul %7, %8, %cst_8 {dimension_numbers = #tpu.dot_dimension_numbers<[1], [0], [0], [1], [0, 0, 1, 1], [], []>} : vector<128x128xf32>, vector<128x128xf32>, vector<128x128xf32> -> vector<128x128xf32>
    %c0_9 = arith.constant 0 : index
    %c0_10 = arith.constant 0 : index
    %10 = vector.load %arg5[%c0_9, %c0_10] : memref<1x128xf32, #tpu.memory_space<vmem>>, vector<1x128xf32>
    %11 = vector.broadcast %10 : vector<1x128xf32> to vector<128x128xf32>
    %12 = arith.addf %9, %11 : vector<128x128xf32>
    %13 = math.tanh %12 : vector<128x128xf32>
    %cst_11 = arith.constant 2.000000e+00 : f32
    %14 = vector.broadcast %cst_11 : f32 to vector<128x128xf32>
    %15 = arith.mulf %14, %13 : vector<128x128xf32>
    %c0_12 = arith.constant 0 : index
    %c0_13 = arith.constant 0 : index
    %16 = vector.load %arg6[%c0_12, %c0_13] : memref<128x128xf32, #tpu.memory_space<vmem>>, vector<128x128xf32>
    tpu.vector_store %arg6[%c0_12, %c0_13], %15 {strides = array<i32>} : memref<128x128xf32, #tpu.memory_space<vmem>>, vector<128x128xf32>,
    return
  }
  func.func @transform_0(%arg0: i32) -> (i32, i32) {
    %c0_i32 = arith.constant 0 : i32
    %c0_i32_0 = arith.constant 0 : i32
    return %arg0, %c0_i32 : i32, i32
  }
  func.func @transform_1(%arg0: i32) -> (i32, i32) {
    %c0_i32 = arith.constant 0 : i32
    %c0_i32_0 = arith.constant 0 : i32
    %c0_i32_1 = arith.constant 0 : i32
    return %c0_i32, %c0_i32_0 : i32, i32
  }
  func.func @transform_2(%arg0: i32) -> (i32, i32) {
    %c0_i32 = arith.constant 0 : i32
    %c0_i32_0 = arith.constant 0 : i32
    %c0_i32_1 = arith.constant 0 : i32
    return %c0_i32, %c0_i32_0 : i32, i32
  }
  func.func @transform_3(%arg0: i32) -> (i32, i32) {
    %c0_i32 = arith.constant 0 : i32
    %c0_i32_0 = arith.constant 0 : i32
    %c0_i32_1 = arith.constant 0 : i32
    return %c0_i32, %c0_i32_0 : i32, i32
  }
  func.func @transform_4(%arg0: i32) -> (i32, i32) {
    %c0_i32 = arith.constant 0 : i32
    %c0_i32_0 = arith.constant 0 : i32
    %c0_i32_1 = arith.constant 0 : i32
    return %c0_i32, %c0_i32_0 : i32, i32
  }
  func.func @transform_5(%arg0: i32) -> (i32, i32) {
    %c0_i32 = arith.constant 0 : i32
    %c0_i32_0 = arith.constant 0 : i32
    return %arg0, %c0_i32 : i32, i32
  }
}

</mosaic_0001>

<bundles_post_ra>
// kernel: actor_net_forward.1
= control target key start
LH: loop header
LB: loop body
LE: loop exit
PB: predicated region body
PF: predicated region fallthrough
CT: control target
= control target key end

     0   :  { %s1040_s18 = smov 0   ;;  %s1200_s0 = inlined_call_operand.vmem [shape: f32[256,32], index: 0, kind: input, shape index: {}]   ;;  %s1201_s1 = inlined_call_operand.vmem [shape: f32[32,128], index: 1, kind: input, shape index: {}]   ;;  %s1202_s2 = inlined_call_operand.vmem [shape: f32[1,128], index: 2, kind: input, shape index: {}]   ;;  %s1203_s3 = inlined_call_operand.vmem [shape: f32[128,128], index: 3, kind: input, shape index: {}]   ;;  %s1204_s4 = inlined_call_operand.vmem [shape: f32[1,128], index: 4, kind: input, shape index: {}]   ;;  %s1205_s5 = inlined_call_operand.vmem [shape: f32[256,128], index: 5, kind: output, shape index: {}]  }
   0x1 LB: > { %s737_s19 = sadd.s32 4294967295, %s1008_s18   ;;  %p741_p0 = scmp.ge.s32.totalorder %s1008_s18, 1  ;;  %s1008_s18 = sphi %s1040_s18, %s15_s18  }
   0x2   : > { %p188_p1 = scmp.lt.s32.totalorder %s1008_s18, 3 }
   0x4   : > { %p189_p2 = pnand %p741_p0, %p188_p1 }
   0x5   : > { %v244_v0 = vld [vmem:[%s1201_s1] sm:$0xff] (!%p189_p2)  ;;  %v245_v1 = vld [vmem:[%s1201_s1 + $0x8] sm:$0xff] (!%p189_p2)  ;;  %v246_v2 = vld [vmem:[%s1201_s1 + $0x10] sm:$0xff] (!%p189_p2)  ;;  %s742_s26 = sshll.u32 (!%p189_p2), %s737_s19, 4  ;;  %vm255_vm0 = vcmask (!%p189_p2), 261120  }
   0x6   : > { %192 = sbr.rel (%p189_p2) target bundleno = 493 (0x1ed), region = 40  ;;  %v906_v3 = vpack.c.bf16 (!%p189_p2), %v245_v1, %v244_v0  ;;  %v247_v4 = vld [vmem:[%s1201_s1 + $0x18] sm:$0xff] (!%p189_p2)  ;;  %p217_p3 = scmp.lt.s32.totalorder (!%p189_p2), %s742_s26, 31  ;;  %v465_v5 = vld [vmem:[%s1203_s3] sm:$0xff] (!%p189_p2)  ;;  %v466_v6 = vld [vmem:[%s1203_s3 + $0x8] sm:$0xff] (!%p189_p2) }
   0x7   : > { %v910_v7 = vpack.c.bf16 (!%p189_p2), %v247_v4, %v246_v2  ;;  %v914_v8 = vpack.c.bf16 (!%p189_p2), %v466_v6, %v465_v5  ;;  %v467_v9 = vld [vmem:[%s1203_s3 + $0x10] sm:$0xff] (!%p189_p2)  ;;  %v468_v10 = vld [vmem:[%s1203_s3 + $0x18] sm:$0xff] (!%p189_p2)  ;;  %v469_v12 = vld [vmem:[%s1203_s3 + $0x20] sm:$0xff] (!%p189_p2) }
   0x8   : > { %907 = vmatprep.subr.bf16.mxu0 (!%p189_p2), %v906_v3  ;;  %v918_v11 = vpack.c.bf16 (!%p189_p2), %v468_v10, %v467_v9  ;;  %v470_v13 = vld [vmem:[%s1203_s3 + $0x28] sm:$0xff] (!%p189_p2)  ;;  %v471_v18 = vld [vmem:[%s1203_s3 + $0x30] sm:$0xff] (!%p189_p2)  ;;  %v472_v19 = vld [vmem:[%s1203_s3 + $0x38] sm:$0xff] (!%p189_p2) }
   0x9   : > { %909 = vmatpush3.bf16.msra.mxu0 (!%p189_p2), %v906_v3  ;;  %946 = vmatprep.subr.bf16.mxu1 (!%p189_p2), %v914_v8  ;;  %v922_v16 = vpack.c.bf16 (!%p189_p2), %v470_v13, %v469_v12  ;;  %v926_v21 = vpack.c.bf16 (!%p189_p2), %v472_v19, %v471_v18  ;;  %v473_v23 = vld [vmem:[%s1203_s3 + $0x40] sm:$0xff] (!%p189_p2)  ;;  %v474_v24 = vld [vmem:[%s1203_s3 + $0x48] sm:$0xff] (!%p189_p2)  ;;  %v475_v28 = vld [vmem:[%s1203_s3 + $0x50] sm:$0xff] (!%p189_p2) }
   0xa   : > { %911 = vmatprep.subr.bf16.mxu0 (!%p189_p2), %v910_v7  ;;  %954 = vmatpush3.bf16.msra.mxu1 (!%p189_p2), %v914_v8  ;;  %v930_v26 = vpack.c.bf16 (!%p189_p2), %v474_v24, %v473_v23  ;;  %v476_v29 = vld [vmem:[%s1203_s3 + $0x58] sm:$0xff] (!%p189_p2)  ;;  %v477_v33 = vld [vmem:[%s1203_s3 + $0x60] sm:$0xff] (!%p189_p2)  ;;  %v478_v34 = vld [vmem:[%s1203_s3 + $0x68] sm:$0xff] (!%p189_p2) }
   0xb   : > { %947 = vmatprep.subr.bf16.mxu1 (!%p189_p2), %v918_v11  ;;  %v934_v31 = vpack.c.bf16 (!%p189_p2), %v476_v29, %v475_v28  ;;  %v938_v36 = vpack.c.bf16 (!%p189_p2), %v478_v34, %v477_v33  ;;  %v479_v43 = vld [vmem:[%s1203_s3 + $0x70] sm:$0xff] (!%p189_p2)  ;;  %v480_v44 = vld [vmem:[%s1203_s3 + $0x78] sm:$0xff] (!%p189_p2)  ;;  %v746_v46 = vld [vmem:[%s1202_s2] ss:$0 sm:$0xff] (!%p189_p2) }
   0xc   : > { %v942_v45 = vpack.c.bf16 (!%p189_p2), %v480_v44, %v479_v43 }
   0xd   : > { %s1207_s26 = smov (!%p217_p3, %s742_s26), 31  ;;  %913 = vmatpush3.bf16.msra.mxu0 %v910_v7 }
   0xe   : > { %s743_s12 = sshll.u32 %s1207_s26, 3  ;;  %915 = vmatprep.subr.bf16.mxu0 %v914_v8  ;;  %955 = vmatpush3.bf16.msra.mxu1 %v918_v11 }
   0xf   : > { %s1086_s20 = scalar_lea.vmem %s1200_s0, %s743_s12  ;;  %948 = vmatprep.subr.bf16.mxu1 %v922_v16  ;;  %s1169_s25 = scalar_lea.vmem %s1205_s5, %s743_s12 }
  0x10   : > { %v228_v14 = vld [vmem:[%s1086_s20] sm:$0xff]  ;;  %v229_v15 = vld [vmem:[%s1086_s20 + $0x8] sm:$0xff]  ;;  %v230_v17 = vld [vmem:[%s1086_s20 + $0x10] sm:$0xff] }
  0x11   : > { %826 = vmatprep.mubr.msk.f32.mxu0 %vm255_vm0, %v228_v14  ;;  %v231_v20 = vld [vmem:[%s1086_s20 + $0x18] sm:$0xff]  ;;  %v232_v22 = vld [vmem:[%s1086_s20 + $0x20] sm:$0xff]  ;;  %v233_v25 = vld [vmem:[%s1086_s20 + $0x28] sm:$0xff] }
  0x12   : > { %827 = vmatmul.mubr.msk.f32.vlgmr.msra.gmra.mrb[0].mxu0 %vm255_vm0, %v229_v15  ;;  %956 = vmatpush3.bf16.msra.mxu1 %v922_v16  ;;  %v234_v27 = vld [vmem:[%s1086_s20 + $0x30] sm:$0xff]  ;;  %v235_v30 = vld [vmem:[%s1086_s20 + $0x38] sm:$0xff]  ;;  %v236_v32 = vld [vmem:[%s1086_s20 + $0x40] sm:$0xff] }
  0x13   : > { %829 = vmatprep.mubr.msk.f32.mxu0 %vm255_vm0, %v230_v17  ;;  %917 = vmatpush3.bf16.msra.mxu0 %v914_v8  ;;  %v237_v35 = vld [vmem:[%s1086_s20 + $0x48] sm:$0xff]  ;;  %v238_v37 = vld [vmem:[%s1086_s20 + $0x50] sm:$0xff]  ;;  %v239_v38 = vld [vmem:[%s1086_s20 + $0x58] sm:$0xff] }
  0x14   : > { %919 = vmatprep.subr.bf16.mxu0 %v918_v11  ;;  %949 = vmatprep.subr.bf16.mxu1 %v926_v21  ;;  %v240_v39 = vld [vmem:[%s1086_s20 + $0x60] sm:$0xff]  ;;  %v241_v40 = vld [vmem:[%s1086_s20 + $0x68] sm:$0xff]  ;;  %v242_v41 = vld [vmem:[%s1086_s20 + $0x70] sm:$0xff] }
  0x15   : > { %v243_v42 = vld [vmem:[%s1086_s20 + $0x78] sm:$0xff] }
  0x16   : > { %830 = vmatmul.mubr.msk.f32.gmra.mrb[2].mxu0 %vm255_vm0, %v231_v20  ;;  %957 = vmatpush3.bf16.msra.mxu1 %v926_v21 }
  0x17   : > { %832 = vmatprep.mubr.msk.f32.mxu0 %vm255_vm0, %v232_v22  ;;  %921 = vmatpush3.bf16.msra.mxu0 %v918_v11 }
  0x18   : > { %923 = vmatprep.subr.bf16.mxu0 %v922_v16  ;;  %950 = vmatprep.subr.bf16.mxu1 %v930_v26 }
  0x1a   : > { %833 = vmatmul.mubr.msk.f32.gmra.mrb[4].mxu0 %vm255_vm0, %v233_v25  ;;  %958 = vmatpush3.bf16.msra.mxu1 %v930_v26 }
  0x1b   : > { %835 = vmatprep.mubr.msk.f32.mxu0 %vm255_vm0, %v234_v27  ;;  %925 = vmatpush3.bf16.msra.mxu0 %v922_v16 }
  0x1c   : > { %927 = vmatprep.subr.bf16.mxu0 %v926_v21  ;;  %951 = vmatprep.subr.bf16.mxu1 %v934_v31 }
  0x1e   : > { %836 = vmatmul.mubr.msk.f32.gmra.mrb[6].mxu0 %vm255_vm0, %v235_v30  ;;  %959 = vmatpush3.bf16.msra.mxu1 %v934_v31 }
  0x1f   : > { %838 = vmatprep.mubr.msk.f32.mxu0 %vm255_vm0, %v236_v32  ;;  %929 = vmatpush3.bf16.msra.mxu0 %v926_v21 }
  0x20   : > { %931 = vmatprep.subr.bf16.mxu0 %v930_v26  ;;  %952 = vmatprep.subr.bf16.mxu1 %v938_v36 }
  0x22   : > { %839 = vmatmul.mubr.msk.f32.gmra.mrb[8].mxu0 %vm255_vm0, %v237_v35  ;;  %960 = vmatpush3.bf16.msra.mxu1 %v938_v36 }
  0x23   : > { %841 = vmatprep.mubr.msk.f32.mxu0 %vm255_vm0, %v238_v37  ;;  %933 = vmatpush3.bf16.msra.mxu0 %v930_v26 }
  0x24   : > { %935 = vmatprep.subr.bf16.mxu0 %v934_v31  ;;  %953 = vmatprep.subr.bf16.mxu1 %v942_v45 }
  0x26   : > { %842 = vmatmul.mubr.msk.f32.gmra.mrb[10].mxu0 %vm255_vm0, %v239_v38  ;;  %961 = vmatpush3.bf16.msra.mxu1 %v942_v45 }
  0x27   : > { %844 = vmatprep.mubr.msk.f32.mxu0 %vm255_vm0, %v240_v39  ;;  %937 = vmatpush3.bf16.msra.mxu0 %v934_v31  ;;  %v1156_v31 = vld [vmem:[%s1204_s4] ss:$0 sm:$0xff] }
  0x28   : > { %939 = vmatprep.subr.bf16.mxu0 %v938_v36 }
  0x2a   : > { %845 = vmatmul.mubr.msk.f32.gmra.mrb[12].mxu0 %vm255_vm0, %v241_v40 }
  0x2b   : > { %847 = vmatprep.mubr.msk.f32.mxu0 %vm255_vm0, %v242_v41  ;;  %941 = vmatpush3.bf16.msra.mxu0 %v938_v36 }
  0x2c   : > { %943 = vmatprep.subr.bf16.mxu0 %v942_v45 }
  0x2e   : > { %848 = vmatmul.mubr.msk.f32.gmra.mrb[14].mxu0 %vm255_vm0, %v243_v42 }
  0x2f   : > { %945 = vmatpush3.bf16.msra.mxu0 %v942_v45 }
  0xe5   : > { %v828_v47 = vpop.f32.mrb[0].mxu0 }
  0xe6   : > { %v376_v48 = vadd.f32 %v828_v47, %v746_v46  ;;  %v370_v49 = vpop.f32.mrb[1].mxu0 }
  0xe7   : > { %v371_v50 = vadd.f32 %v746_v46, %v370_v49 }
  0xe8   : > { %v450_v53 = vmax.f32 %v376_v48, 0.0 }
  0xe9   : > { %v449_v51 = vmax.f32 %v371_v50, 0.0  ;;  %v831_v52 = vpop.f32.mrb[2].mxu0 }
  0xea   : > { %v386_v54 = vadd.f32 %v831_v52, %v746_v46  ;;  %v380_v55 = vpop.f32.mrb[3].mxu0 }
  0xeb   : > { %v381_v56 = vadd.f32 %v746_v46, %v380_v55  ;;  %882 = vmatprep.mubr.f32.mxu0 %v449_v51 }
  0xec   : > { %883 = vmatmul.mubr.f32.vlgmr.msra.gmra.mrb[16].mxu0 %v450_v53  ;;  %v452_v59 = vmax.f32 %v386_v54, 0.0 }
  0xed   : > { %v451_v57 = vmax.f32 %v381_v56, 0.0  ;;  %v834_v58 = vpop.f32.mrb[4].mxu0 }
  0xee   : > { %v396_v60 = vadd.f32 %v834_v58, %v746_v46  ;;  %v390_v61 = vpop.f32.mrb[5].mxu0 }
  0xef   : > { %v391_v62 = vadd.f32 %v746_v46, %v390_v61  ;;  %885 = vmatprep.mubr.f32.mxu0 %v451_v57 }
  0xf0   : > { %886 = vmatmul.mubr.f32.gmra.mrb[18].mxu0 %v452_v59  ;;  %v454_v1 = vmax.f32 %v396_v60, 0.0 }
  0xf1   : > { %v453_v63 = vmax.f32 %v391_v62, 0.0  ;;  %v837_v0 = vpop.f32.mrb[6].mxu0 }
  0xf2   : > { %v406_v2 = vadd.f32 %v837_v0, %v746_v46  ;;  %v400_v3 = vpop.f32.mrb[7].mxu0 }
  0xf3   : > { %888 = vmatprep.mubr.f32.mxu0 %v453_v63  ;;  %v401_v4 = vadd.f32 %v746_v46, %v400_v3 }
  0xf4   : > { %889 = vmatmul.mubr.f32.gmra.mrb[20].mxu0 %v454_v1  ;;  %v456_v7 = vmax.f32 %v406_v2, 0.0 }
  0xf5   : > { %v840_v5 = vpop.f32.mrb[8].mxu0  ;;  %v455_v6 = vmax.f32 %v401_v4, 0.0 }
  0xf6   : > { %v416_v8 = vadd.f32 %v840_v5, %v746_v46  ;;  %v410_v9 = vpop.f32.mrb[9].mxu0 }
  0xf7   : > { %v411_v10 = vadd.f32 %v746_v46, %v410_v9  ;;  %891 = vmatprep.mubr.f32.mxu1 %v455_v6 }
  0xf8   : > { %892 = vmatmul.mubr.f32.vlgmr.msra.gmra.mrb[0].mxu1 %v456_v7  ;;  %v458_v13 = vmax.f32 %v416_v8, 0.0 }
  0xf9   : > { %v457_v11 = vmax.f32 %v411_v10, 0.0  ;;  %v843_v12 = vpop.f32.mrb[10].mxu0 }
  0xfa   : > { %v426_v14 = vadd.f32 %v843_v12, %v746_v46  ;;  %v420_v15 = vpop.f32.mrb[11].mxu0 }
  0xfb   : > { %v421_v16 = vadd.f32 %v746_v46, %v420_v15  ;;  %894 = vmatprep.mubr.f32.mxu1 %v457_v11 }
  0xfc   : > { %895 = vmatmul.mubr.f32.gmra.mrb[2].mxu1 %v458_v13  ;;  %v460_v19 = vmax.f32 %v426_v14, 0.0 }
  0xfd   : > { %v459_v17 = vmax.f32 %v421_v16, 0.0  ;;  %v846_v18 = vpop.f32.mrb[12].mxu0 }
  0xfe   : > { %v436_v20 = vadd.f32 %v846_v18, %v746_v46  ;;  %v430_v21 = vpop.f32.mrb[13].mxu0 }
  0xff   : > { %v431_v22 = vadd.f32 %v746_v46, %v430_v21  ;;  %897 = vmatprep.mubr.f32.mxu1 %v459_v17 }
 0x100   : > { %898 = vmatmul.mubr.f32.gmra.mrb[4].mxu1 %v460_v19  ;;  %v462_v25 = vmax.f32 %v436_v20, 0.0 }
 0x101   : > { %v461_v23 = vmax.f32 %v431_v22, 0.0  ;;  %v849_v24 = vpop.f32.mrb[14].mxu0 }
 0x102   : > { %v446_v26 = vadd.f32 %v849_v24, %v746_v46  ;;  %v440_v27 = vpop.f32.mrb[15].mxu0 }
 0x103   : > { %v441_v28 = vadd.f32 %v746_v46, %v440_v27  ;;  %900 = vmatprep.mubr.f32.mxu1 %v461_v23 }
 0x104   : > { %901 = vmatmul.mubr.f32.gmra.mrb[6].mxu1 %v462_v25  ;;  %v464_v30 = vmax.f32 %v446_v26, 0.0 }
 0x105   : > { %v463_v29 = vmax.f32 %v441_v28, 0.0 }
 0x107   : > { %903 = vmatprep.mubr.f32.mxu1 %v463_v29 }
 0x108   : > { %904 = vmatmul.mubr.f32.gmra.mrb[8].mxu1 %v464_v30 }
 0x1bf   : > { %v884_v32 = vpop.f32.mrb[16].mxu0 }
 0x1c0   : > { %v560_v33 = vadd.f32 %v884_v32, %v1156_v31  ;;  %v554_v34 = vpop.f32.mrb[17].mxu0 }
 0x1c1   : > { %v555_v35 = vadd.f32 %v1156_v31, %v554_v34 }
 0x1c2   : > { %970 = vtanh.f32 %v560_v33 }
 0x1c3   : > { %972 = vtanh.f32 %v555_v35  ;;  %v887_v36 = vpop.f32.mrb[18].mxu0 }
 0x1c4   : > { %v570_v37 = vadd.f32 %v887_v36, %v1156_v31  ;;  %v564_v38 = vpop.f32.mrb[19].mxu0 }
 0x1c5   : > { %v565_v39 = vadd.f32 %v1156_v31, %v564_v38 }
 0x1c6   : > { %974 = vtanh.f32 %v570_v37 }
 0x1c7   : > { %976 = vtanh.f32 %v565_v39  ;;  %v890_v40 = vpop.f32.mrb[20].mxu0 }
 0x1c8   : > { %v580_v41 = vadd.f32 %v890_v40, %v1156_v31  ;;  %v574_v42 = vpop.f32.mrb[21].mxu0 }
 0x1c9   : > { %v575_v43 = vadd.f32 %v1156_v31, %v574_v42 }
 0x1ca   : > { %978 = vtanh.f32 %v580_v41 }
 0x1cb   : > { %980 = vtanh.f32 %v575_v43  ;;  %v893_v44 = vpop.f32.mrb[0].mxu1 }
 0x1cc   : > { %v971_v45 = vpop.eup %970  ;;  %v590_v46 = vadd.f32 %v893_v44, %v1156_v31  ;;  %v584_v47 = vpop.f32.mrb[1].mxu1 }
 0x1cd   : > { %v973_v48 = vpop.eup %972  ;;  %v650_v49 = vmul.f32 2.0, %v971_v45  ;;  %v585_v50 = vadd.f32 %v1156_v31, %v584_v47 }
 0x1ce   : > { %v649_v51 = vmul.f32 2.0, %v973_v48  ;;  %982 = vtanh.f32 %v590_v46 }
 0x1cf   : > { %666 = vst [vmem:[%s1169_s25 + $0x8] sm:$0xff] %v650_v49  ;;  %984 = vtanh.f32 %v585_v50  ;;  %v896_v52 = vpop.f32.mrb[2].mxu1 }
 0x1d0   : > { %v975_v53 = vpop.eup %974  ;;  %665 = vst [vmem:[%s1169_s25] sm:$0xff] %v649_v51  ;;  %v600_v54 = vadd.f32 %v896_v52, %v1156_v31  ;;  %v594_v55 = vpop.f32.mrb[3].mxu1 }
 0x1d1   : > { %v977_v56 = vpop.eup %976  ;;  %v652_v57 = vmul.f32 2.0, %v975_v53  ;;  %v595_v58 = vadd.f32 %v1156_v31, %v594_v55 }
 0x1d2   : > { %v651_v59 = vmul.f32 2.0, %v977_v56  ;;  %986 = vtanh.f32 %v600_v54 }
 0x1d3   : > { %668 = vst [vmem:[%s1169_s25 + $0x18] sm:$0xff] %v652_v57  ;;  %988 = vtanh.f32 %v595_v58  ;;  %v899_v60 = vpop.f32.mrb[4].mxu1 }
 0x1d4   : > { %v979_v61 = vpop.eup %978  ;;  %667 = vst [vmem:[%s1169_s25 + $0x10] sm:$0xff] %v651_v59  ;;  %v610_v62 = vadd.f32 %v899_v60, %v1156_v31  ;;  %v604_v63 = vpop.f32.mrb[5].mxu1 }
 0x1d5   : > { %v981_v0 = vpop.eup %980  ;;  %v654_v1 = vmul.f32 2.0, %v979_v61  ;;  %v605_v2 = vadd.f32 %v1156_v31, %v604_v63 }
 0x1d6   : > { %v653_v3 = vmul.f32 2.0, %v981_v0  ;;  %990 = vtanh.f32 %v610_v62 }
 0x1d7   : > { %670 = vst [vmem:[%s1169_s25 + $0x28] sm:$0xff] %v654_v1  ;;  %992 = vtanh.f32 %v605_v2  ;;  %v902_v4 = vpop.f32.mrb[6].mxu1 }
 0x1d8   : > { %v983_v5 = vpop.eup %982  ;;  %669 = vst [vmem:[%s1169_s25 + $0x20] sm:$0xff] %v653_v3  ;;  %v620_v6 = vadd.f32 %v902_v4, %v1156_v31  ;;  %v614_v7 = vpop.f32.mrb[7].mxu1 }
 0x1d9   : > { %v985_v8 = vpop.eup %984  ;;  %v656_v9 = vmul.f32 2.0, %v983_v5  ;;  %v615_v10 = vadd.f32 %v1156_v31, %v614_v7 }
 0x1da   : > { %v655_v11 = vmul.f32 2.0, %v985_v8  ;;  %994 = vtanh.f32 %v620_v6 }
 0x1db   : > { %672 = vst [vmem:[%s1169_s25 + $0x38] sm:$0xff] %v656_v9  ;;  %996 = vtanh.f32 %v615_v10  ;;  %v905_v12 = vpop.f32.mrb[8].mxu1 }
 0x1dc   : > { %v987_v13 = vpop.eup %986  ;;  %671 = vst [vmem:[%s1169_s25 + $0x30] sm:$0xff] %v655_v11  ;;  %v630_v14 = vadd.f32 %v905_v12, %v1156_v31  ;;  %v624_v15 = vpop.f32.mrb[9].mxu1 }
 0x1dd   : > { %v989_v16 = vpop.eup %988  ;;  %v658_v17 = vmul.f32 2.0, %v987_v13  ;;  %v625_v18 = vadd.f32 %v1156_v31, %v624_v15 }
 0x1de   : > { %v657_v19 = vmul.f32 2.0, %v989_v16  ;;  %998 = vtanh.f32 %v630_v14 }
 0x1df   : > { %674 = vst [vmem:[%s1169_s25 + $0x48] sm:$0xff] %v658_v17  ;;  %1000 = vtanh.f32 %v625_v18 }
 0x1e0   : > { %v991_v20 = vpop.eup %990  ;;  %673 = vst [vmem:[%s1169_s25 + $0x40] sm:$0xff] %v657_v19 }
 0x1e1   : > { %v993_v21 = vpop.eup %992  ;;  %v660_v22 = vmul.f32 2.0, %v991_v20 }
 0x1e2   : > { %v659_v23 = vmul.f32 2.0, %v993_v21 }
 0x1e3   : > { %676 = vst [vmem:[%s1169_s25 + $0x58] sm:$0xff] %v660_v22 }
 0x1e4   : > { %v995_v24 = vpop.eup %994  ;;  %675 = vst [vmem:[%s1169_s25 + $0x50] sm:$0xff] %v659_v23 }
 0x1e5   : > { %v997_v25 = vpop.eup %996  ;;  %v662_v26 = vmul.f32 2.0, %v995_v24 }
 0x1e6   : > { %v661_v27 = vmul.f32 2.0, %v997_v25 }
 0x1e7   : > { %678 = vst [vmem:[%s1169_s25 + $0x68] sm:$0xff] %v662_v26 }
 0x1e8   : > { %v999_v28 = vpop.eup %998  ;;  %677 = vst [vmem:[%s1169_s25 + $0x60] sm:$0xff] %v661_v27 }
 0x1e9   : > { %v1001_v29 = vpop.eup %1000  ;;  %v664_v30 = vmul.f32 2.0, %v999_v28 }
 0x1ea   : > { %v663_v31 = vmul.f32 2.0, %v1001_v29 }
 0x1eb   : > { %680 = vst [vmem:[%s1169_s25 + $0x78] sm:$0xff] %v664_v30 }
 0x1ec   : > { %679 = vst [vmem:[%s1169_s25 + $0x70] sm:$0xff] %v663_v31 }
 0x1ed PF: > { %s15_s18 = sadd.s32 1, %s1008_s18  }
 0x1ee   : > { %p12_p4 = scmp.ge.s32.totalorder %s15_s18, 4  }
 0x1f0   :  { %14 = sbr.rel (!%p12_p4) target bundleno = 1 (0x1), region = 70 }

</bundles_post_ra>
